<compile_context>
chip_gen: v5e
topology: v5e:2x2
jax: 0.10.0
libtpu: 0.0.40
codegen_flags: <defaults>
</compile_context>

<pallas_src>
import functools

import jax
import jax.numpy as jnp
from jax.experimental import pallas as pl
from jax.experimental.pallas import tpu as pltpu


def _round_up(v, m):
    return (v + m - 1) // m * m


# --------------------------------------------------------------------------
# Kernel
# --------------------------------------------------------------------------
def gnn_kernel(a_ref, x_ref, w1t_ref, w2t_ref, w3t_ref, out_ref):
    """Fused 3-layer GCN forward.

    a_ref   : [Np, Np]  bf16, symmetric-normalized adjacency (zero padded)
    x_ref   : [Np, Di]  bf16, node features (zero padded)
    w*t_ref : [Di, Do]  bf16, weights already transposed to [in, out]
    out_ref : [Np, Do]  f32, lane-dense (Do is a multiple of 128)
    """
    A = a_ref[...]
    X = x_ref[...]

    # layer 1: relu((A @ X) @ W1^T)   (W1 pre-transposed -> no in-kernel .T)
    h = jnp.dot(A, X, preferred_element_type=jnp.float32)
    h = jnp.dot(h.astype(jnp.bfloat16), w1t_ref[...],
                preferred_element_type=jnp.float32)
    h = jnp.maximum(h, 0.0).astype(jnp.bfloat16)  # ReLU on f32 acc, bf16 next

    # layer 2: relu((A @ h) @ W2^T)
    h = jnp.dot(A, h, preferred_element_type=jnp.float32)
    h = jnp.dot(h.astype(jnp.bfloat16), w2t_ref[...],
                preferred_element_type=jnp.float32)
    h = jnp.maximum(h, 0.0).astype(jnp.bfloat16)

    # layer 3: (A @ h) @ W3^T
    h = jnp.dot(A, h, preferred_element_type=jnp.float32)
    out_ref[...] = jnp.dot(h.astype(jnp.bfloat16), w3t_ref[...],
                           preferred_element_type=jnp.float32)


# --------------------------------------------------------------------------
# Host-side one-time weight preparation (hoisted out of the per-call path)
# --------------------------------------------------------------------------
def prepare_gnn_weights(W1, W2, W3):
    """Pads + transposes PyTorch-Linear-layout weights ([out, in]) once,
    producing MXU-ready bf16 [in_padded, out_padded] tensors.  Call at init,
    not per forward."""
    dim_in = W1.shape[1]
    dim_out = W3.shape[0]
    Di = _round_up(dim_in, 128)
    Do = _round_up(dim_out, 128)
    cdt = jnp.bfloat16
    W1t = jnp.zeros((Di, Di), cdt).at[:dim_in, :dim_in].set(W1.T.astype(cdt))
    W2t = jnp.zeros((Di, Di), cdt).at[:dim_in, :dim_in].set(W2.T.astype(cdt))
    W3t = jnp.zeros((Di, Do), cdt).at[:dim_in, :dim_out].set(W3.T.astype(cdt))
    return W1t, W2t, W3t


# --------------------------------------------------------------------------
# normed_A (preprocessing glue, JAX)
# --------------------------------------------------------------------------
def normed_A(z):
    """JAX equivalent of GNN.normed_A.

    cdist in Gram-matrix form: ||zi - zj||^2 = ||zi||^2 + ||zj||^2 - 2 zi.zj
    (one matmul instead of an [N, N, z_dim] broadcast temporary)."""
    z = z.astype(jnp.float32)
    sq = jnp.sum(z * z, axis=-1)
    d2 = sq[:, None] + sq[None, :] - 2.0 * (z @ z.T)
    Dis = jnp.sqrt(jnp.maximum(d2, 0.0))

    m = Dis.mean()
    N = Dis.shape[0]
    A = jnp.eye(N, dtype=jnp.float32)
    A = jnp.where(Dis < m, 1.0, A)                 # A[Dis < m] = 1
    remain_persent = A.sum() / (N * N)

    degree = A.sum(axis=1)
    d_inv_sqrt = degree ** -0.5
    # D @ A @ D as row/col scaling (no diag matmuls)
    A_norm = A * d_inv_sqrt[:, None] * d_inv_sqrt[None, :]
    return A_norm, remain_persent


# --------------------------------------------------------------------------
# Fused end-to-end forward: normed_A + padding + kernel under ONE jit
# --------------------------------------------------------------------------
@functools.partial(jax.jit, static_argnames=("n", "dim_in", "dim_out"))
def gnn_apply(z, X, W1t, W2t, W3t, *, n, dim_in, dim_out):
    """adjacency construction + pads + fused GCN kernel, one executable."""
    A, remain_persent = normed_A(z)

    cdt = jnp.bfloat16
    Np = _round_up(n, 16)        # bf16 sublane pack
    Di = W1t.shape[0]            # already padded to lane width
    Do = W3t.shape[1]

    # Zero-pad to lane/sublane-dense shapes (exact for matmul + ReLU chain).
    A_p = jnp.zeros((Np, Np), cdt).at[:n, :n].set(A.astype(cdt))
    X_p = jnp.zeros((Np, Di), cdt).at[:n, :dim_in].set(X.astype(cdt))

    # Scheduler hint: 6 chained dots.
    flops = (3 * 2 * Np * Np * Di) + (2 * 2 * Np * Di * Di) + (2 * Np * Di * Do)
    in_bytes = 2 * (Np * Np + Np * Di + 2 * Di * Di + Di * Do)   # bf16 inputs
    out_bytes = 4 * Np * Do                                      # f32 output
    cost = pl.CostEstimate(flops=flops, transcendentals=0,
                           bytes_accessed=in_bytes + out_bytes)

    # VMEM budget: double-buffered inputs + output + f32 intermediates,
    # clamped to 64 MiB so it is also valid on v7x (64 MiB physical per TC).
    vmem_needed = 2 * in_bytes + 2 * out_bytes + 2 * 4 * Np * max(Di, Do)
    vmem_limit = int(min(max(2 * vmem_needed, 16 << 20), 64 << 20))

    full = lambda shape: pl.BlockSpec(shape, lambda: tuple(0 for _ in shape))

    out_p = pl.pallas_call(
        gnn_kernel,
        out_shape=jax.ShapeDtypeStruct((Np, Do), jnp.float32),
        in_specs=[
            full(A_p.shape),
            full(X_p.shape),
            full(W1t.shape),
            full(W2t.shape),
            full(W3t.shape),
        ],
        out_specs=full((Np, Do)),
        cost_estimate=cost,
        compiler_params=pltpu.CompilerParams(vmem_limit_bytes=vmem_limit),
    )(A_p, X_p, W1t, W2t, W3t)

    return out_p[:n, :dim_out], remain_persent


def init_linear_weight(key, out_features, in_features):
    # PyTorch nn.Linear default init: uniform(-1/sqrt(fan_in), 1/sqrt(fan_in))
    bound = 1.0 / jnp.sqrt(jnp.float32(in_features))
    return jax.random.uniform(
        key, (out_features, in_features), dtype=jnp.float32,
        minval=-bound, maxval=bound)


if __name__ == "__main__":
    N = 16        # number of graph nodes
    dim_in = 32   # input feature dim
    dim_out = 16  # output feature dim
    z_dim = 4     # latent dim used to build the adjacency

    key = jax.random.PRNGKey(0)
    kx, kz, k1, k2, k3 = jax.random.split(key, 5)

    X = jax.random.normal(kx, (N, dim_in), dtype=jnp.float32)
    z = jax.random.normal(kz, (N, z_dim), dtype=jnp.float32)

    W1 = init_linear_weight(k1, dim_in, dim_in)   # fc1
    W2 = init_linear_weight(k2, dim_in, dim_in)   # fc2
    W3 = init_linear_weight(k3, dim_out, dim_in)  # fc3

    # One-time weight prep (hoisted out of the forward path).
    W1t, W2t, W3t = prepare_gnn_weights(W1, W2, W3)
    W1t, W2t, W3t = jax.block_until_ready((W1t, W2t, W3t))

    # Fused forward: normed_A + pads + kernel, one executable.
    out, remain = gnn_apply(z, X, W1t, W2t, W3t,
                            n=N, dim_in=dim_in, dim_out=dim_out)
    out = jax.block_until_ready(out)
    assert out.shape == (N, dim_out)

    # Reference 1: plain-JAX mirror of the kernel's bf16-in / f32-accumulate
    # dtype pattern (tight tolerance -> the kernel computes what it claims).
    def _bf(x):
        return x.astype(jnp.bfloat16).astype(jnp.float32)

    A_ref, _ = normed_A(z)
    Ab, Xb = _bf(A_ref), _bf(X)
    W1b, W2b, W3b = _bf(W1), _bf(W2), _bf(W3)
    h = jnp.dot(Ab, Xb)
    h = _bf(jnp.maximum(jnp.dot(_bf(h), W1b.T), 0.0))
    h = jnp.dot(Ab, h)
    h = _bf(jnp.maximum(jnp.dot(_bf(h), W2b.T), 0.0))
    h = jnp.dot(Ab, h)
    ref_bf16 = jnp.dot(_bf(h), W3b.T)
    assert jnp.allclose(out, ref_bf16, atol=1e-3, rtol=1e-3)

    # Reference 2: full-f32 forward (loose tolerance -> bf16 quantization only).
    h = jnp.maximum((A_ref @ X) @ W1.T, 0.0)
    h = jnp.maximum((A_ref @ h) @ W2.T, 0.0)
    ref_f32 = (A_ref @ h) @ W3.T
    assert jnp.allclose(out, ref_f32, atol=1e-1, rtol=1e-1)

    print("KERNEL_OK")
</pallas_src>

<mosaic_0001>
module attributes {stable_mosaic.version = 11 : i64} {
  func.func @gnn_kernel(%arg0: memref<16x16xbf16, #tpu.memory_space<vmem>>, %arg1: memref<16x128xbf16, #tpu.memory_space<vmem>>, %arg2: memref<128x128xbf16, #tpu.memory_space<vmem>>, %arg3: memref<128x128xbf16, #tpu.memory_space<vmem>>, %arg4: memref<128x128xbf16, #tpu.memory_space<vmem>>, %arg5: memref<16x128xf32, #tpu.memory_space<vmem>>) attributes {dimension_semantics = [], scalar_prefetch = 0 : i64, scratch_operands = 0 : i64, tpu.core_type = #tpu.core_type<tc>} {
    %c0 = arith.constant 0 : index
    %c0_0 = arith.constant 0 : index
    %0 = vector.load %arg0[%c0, %c0_0] : memref<16x16xbf16, #tpu.memory_space<vmem>>, vector<16x16xbf16>
    %c0_1 = arith.constant 0 : index
    %c0_2 = arith.constant 0 : index
    %1 = vector.load %arg1[%c0_1, %c0_2] : memref<16x128xbf16, #tpu.memory_space<vmem>>, vector<16x128xbf16>
    %cst = arith.constant dense<0.000000e+00> : vector<16x128xf32>
    %2 = tpu.matmul %0, %1, %cst {dimension_numbers = #tpu.dot_dimension_numbers<[1], [0], [0], [1], [0, 0, 1, 1], [], []>} : vector<16x16xbf16>, vector<16x128xbf16>, vector<16x128xf32> -> vector<16x128xf32>
    %3 = arith.truncf %2 : vector<16x128xf32> to vector<16x128xbf16>
    %c0_3 = arith.constant 0 : index
    %c0_4 = arith.constant 0 : index
    %4 = vector.load %arg2[%c0_3, %c0_4] : memref<128x128xbf16, #tpu.memory_space<vmem>>, vector<128x128xbf16>
    %cst_5 = arith.constant dense<0.000000e+00> : vector<16x128xf32>
    %5 = tpu.matmul %3, %4, %cst_5 {dimension_numbers = #tpu.dot_dimension_numbers<[1], [0], [0], [1], [0, 0, 1, 1], [], []>} : vector<16x128xbf16>, vector<128x128xbf16>, vector<16x128xf32> -> vector<16x128xf32>
    %cst_6 = arith.constant 0.000000e+00 : f32
    %6 = vector.broadcast %cst_6 : f32 to vector<16x128xf32>
    %7 = arith.maximumf %5, %6 : vector<16x128xf32>
    %8 = arith.truncf %7 : vector<16x128xf32> to vector<16x128xbf16>
    %cst_7 = arith.constant dense<0.000000e+00> : vector<16x128xf32>
    %9 = tpu.matmul %0, %8, %cst_7 {dimension_numbers = #tpu.dot_dimension_numbers<[1], [0], [0], [1], [0, 0, 1, 1], [], []>} : vector<16x16xbf16>, vector<16x128xbf16>, vector<16x128xf32> -> vector<16x128xf32>
    %10 = arith.truncf %9 : vector<16x128xf32> to vector<16x128xbf16>
    %c0_8 = arith.constant 0 : index
    %c0_9 = arith.constant 0 : index
    %11 = vector.load %arg3[%c0_8, %c0_9] : memref<128x128xbf16, #tpu.memory_space<vmem>>, vector<128x128xbf16>
    %cst_10 = arith.constant dense<0.000000e+00> : vector<16x128xf32>
    %12 = tpu.matmul %10, %11, %cst_10 {dimension_numbers = #tpu.dot_dimension_numbers<[1], [0], [0], [1], [0, 0, 1, 1], [], []>} : vector<16x128xbf16>, vector<128x128xbf16>, vector<16x128xf32> -> vector<16x128xf32>
    %cst_11 = arith.constant 0.000000e+00 : f32
    %13 = vector.broadcast %cst_11 : f32 to vector<16x128xf32>
    %14 = arith.maximumf %12, %13 : vector<16x128xf32>
    %15 = arith.truncf %14 : vector<16x128xf32> to vector<16x128xbf16>
    %cst_12 = arith.constant dense<0.000000e+00> : vector<16x128xf32>
    %16 = tpu.matmul %0, %15, %cst_12 {dimension_numbers = #tpu.dot_dimension_numbers<[1], [0], [0], [1], [0, 0, 1, 1], [], []>} : vector<16x16xbf16>, vector<16x128xbf16>, vector<16x128xf32> -> vector<16x128xf32>
    %17 = arith.truncf %16 : vector<16x128xf32> to vector<16x128xbf16>
    %c0_13 = arith.constant 0 : index
    %c0_14 = arith.constant 0 : index
    %18 = vector.load %arg4[%c0_13, %c0_14] : memref<128x128xbf16, #tpu.memory_space<vmem>>, vector<128x128xbf16>
    %cst_15 = arith.constant dense<0.000000e+00> : vector<16x128xf32>
    %19 = tpu.matmul %17, %18, %cst_15 {dimension_numbers = #tpu.dot_dimension_numbers<[1], [0], [0], [1], [0, 0, 1, 1], [], []>} : vector<16x128xbf16>, vector<128x128xbf16>, vector<16x128xf32> -> vector<16x128xf32>
    %c0_16 = arith.constant 0 : index
    %c0_17 = arith.constant 0 : index
    %20 = vector.load %arg5[%c0_16, %c0_17] : memref<16x128xf32, #tpu.memory_space<vmem>>, vector<16x128xf32>
    tpu.vector_store %arg5[%c0_16, %c0_17], %19 {strides = array<i32>} : memref<16x128xf32, #tpu.memory_space<vmem>>, vector<16x128xf32>,
    return
  }
}

</mosaic_0001>

<bundles_post_ra>
// kernel: gnn_apply.1
= control target key start
LH: loop header
LB: loop body
LE: loop exit
PB: predicated region body
PF: predicated region fallthrough
CT: control target
= control target key end

     0   :  { %10 = vsyncpa [#allocation3], 0  ;;  %s682_s0 = inlined_call_operand.vmem [shape: bf16[16,16], index: 0, kind: input, shape index: {}]   ;;  %s683_s1 = inlined_call_operand.vmem [shape: bf16[16,128], index: 1, kind: input, shape index: {}]   ;;  %s684_s2 = inlined_call_operand.vmem [shape: bf16[128,128], index: 2, kind: input, shape index: {}]   ;;  %s685_s3 = inlined_call_operand.hbm [shape: bf16[128,128], index: 3, kind: input, shape index: {}]   ;;  %s686_s4 = inlined_call_operand.hbm [shape: bf16[128,128], index: 4, kind: input, shape index: {}]   ;;  %s687_s5 = inlined_call_operand.hbm [shape: f32[16,128], index: 5, kind: output, shape index: {}]  }
   0x1   :  { %11 = vsyncpa [#allocation6], 0 }
   0x2   :  { %12 = vsyncpa [#allocation4], 0  ;;  %s23_s20 = sshll.u32 %s685_s3, 4  ;;  %s598_s21 = smov [#allocation2]   ;;  %s24_s20 = int_to_ptr.hbm [resolvable:$true] %s23_s20 }
   0x3   :  { %s25_s22 = sshll.u32 %s598_s21, 4  ;;  %s36_s25 = sshll.u32 %s686_s4, 4  ;;  %s26_s22 = int_to_ptr.vmem [resolvable:$true] %s25_s22  ;;  %s37_s25 = int_to_ptr.hbm [resolvable:$true] %s36_s25 }
   0x4   :  { %s599_s26 = smov 64   ;;  %s600_s27 = smov 4  }
   0x5   :  { %31 = dma.hbm_to_vmem [thread:$0]  %s24_s20, 1024, %s26_s22, [#allocation3], %s599_s26, %s599_s26, %s600_s27  }
   0x6   :  { %s601_s28 = smov [#allocation5]  }
   0x7   :  { %s38_s29 = sshll.u32 %s601_s28, 4  ;;  %s39_s29 = int_to_ptr.vmem [resolvable:$true] %s38_s29 }
   0x8   :  { %44 = dma.hbm_to_vmem [thread:$0]  %s37_s25, 1024, %s39_s29, [#allocation6], %s599_s26, %s599_s26, %s600_s27  }
   0x9   :  { %592 = dma.done.wait [#allocation3], 1024  }
   0xa   :  { %593 = vsyncadd [#allocation3], 4294966272 }
   0xb   :  { %594 = dma.done.wait [#allocation6], 1024  }
   0xc   :  { %595 = vsyncadd [#allocation6], 4294966272  ;;  %v488_v0 = vld [vmem:[%s683_s1] sm:$0xff]  ;;  %v496_v1 = vld [vmem:[%s684_s2 + $0x38] sm:$0xff]  ;;  %vm69_vm0 = vcmask 130048   ;;  %s366_s24 = sshll.u32 %s687_s5, 4  ;;  %s367_s24 = int_to_ptr.hbm [resolvable:$true] %s366_s24 }
   0xd   :  { %v650_v2 = vld [vmem:[%s682_s0] sm:$0xff]  ;;  %80 = vmatpush.bf16.msra.mxu0 %v488_v0  ;;  %152 = vmatpush.bf16.msra.mxu1 %v496_v1  ;;  %v495_v3 = vld [vmem:[%s684_s2 + $0x30] sm:$0xff]  ;;  %v494_v4 = vld [vmem:[%s684_s2 + $0x28] sm:$0xff]  ;;  %s603_s25 = smov 128   ;;  %s604_s26 = smov 8  }
   0xe   :  { %v493_v5 = vld [vmem:[%s684_s2 + $0x20] sm:$0xff]  ;;  %v492_v6 = vld [vmem:[%s684_s2 + $0x18] sm:$0xff]  ;;  %v491_v7 = vld [vmem:[%s684_s2 + $0x10] sm:$0xff] }
   0xf   :  { %v490_v8 = vld [vmem:[%s684_s2 + $0x8] sm:$0xff]  ;;  %v489_v9 = vld [vmem:[%s684_s2] sm:$0xff]  ;;  %v504_v13 = vld [vmem:[#allocation2 + $0x38] sm:$0xff]  ;;  %s602_s2 = smov [#allocation7]  }
  0x10   :  { %388 = vmatmul.msk.bf16.vlgmr.msra.gmra.mxu0 %vm69_vm0, %v650_v2  ;;  %248 = vmatpush.bf16.msra.mxu3 %v504_v13  ;;  %v503_v14 = vld [vmem:[#allocation2 + $0x30] sm:$0xff]  ;;  %v502_v15 = vld [vmem:[#allocation2 + $0x28] sm:$0xff]  ;;  %v501_v16 = vld [vmem:[#allocation2 + $0x20] sm:$0xff]  ;;  %s364_s21 = sshll.u32 %s602_s2, 4  ;;  %s365_s21 = int_to_ptr.vmem [resolvable:$true] %s364_s21 }
  0x11   :  { %153 = vmatpush.bf16.msra.mxu1 %v495_v3  ;;  %v500_v17 = vld [vmem:[#allocation2 + $0x18] sm:$0xff]  ;;  %v499_v23 = vld [vmem:[#allocation2 + $0x10] sm:$0xff]  ;;  %v498_v24 = vld [vmem:[#allocation2 + $0x8] sm:$0xff] }
  0x12   :  { %v497_v25 = vld [vmem:[#allocation2] sm:$0xff]  ;;  %v512_v29 = vld [vmem:[#allocation5 + $0x38] sm:$0xff]  ;;  %v511_v30 = vld [vmem:[#allocation5 + $0x30] sm:$0xff] }
  0x13   :  { %v510_v31 = vld [vmem:[#allocation5 + $0x28] sm:$0xff]  ;;  %v509_v32 = vld [vmem:[#allocation5 + $0x20] sm:$0xff]  ;;  %v508_v33 = vld [vmem:[#allocation5 + $0x18] sm:$0xff] }
  0x14   :  { %249 = vmatpush.bf16.msra.mxu3 %v503_v14  ;;  %v507_v39 = vld [vmem:[#allocation5 + $0x10] sm:$0xff]  ;;  %v506_v40 = vld [vmem:[#allocation5 + $0x8] sm:$0xff]  ;;  %v505_v41 = vld [vmem:[#allocation5] sm:$0xff] }
  0x15   :  { %154 = vmatpush.bf16.msra.mxu1 %v494_v4 }
  0x18   :  { %250 = vmatpush.bf16.msra.mxu3 %v502_v15 }
  0x19   :  { %155 = vmatpush.bf16.msra.mxu1 %v493_v5 }
  0x1c   :  { %251 = vmatpush.bf16.msra.mxu3 %v501_v16 }
  0x1d   :  { %156 = vmatpush.bf16.msra.mxu1 %v492_v6 }
  0x20   :  { %252 = vmatpush.bf16.msra.mxu3 %v500_v17 }
  0x21   :  { %157 = vmatpush.bf16.msra.mxu1 %v491_v7 }
  0x24   :  { %253 = vmatpush.bf16.msra.mxu3 %v499_v23 }
  0x25   :  { %158 = vmatpush.bf16.msra.mxu1 %v490_v8 }
  0x28   :  { %254 = vmatpush.bf16.msra.mxu3 %v498_v24 }
  0x29   :  { %159 = vmatpush.bf16.msra.mxu1 %v489_v9 }
  0x2c   :  { %255 = vmatpush.bf16.msra.mxu3 %v497_v25 }
  0x8d   :  { %v82_v10 = vpop.f32.mrf.mxu0 }
  0x95   :  { %v84_v11 = vpop.f32.mrf.mxu0 }
  0x96   :  { %v87_v12 = vpack.c.bf16 %v84_v11, %v82_v10 }
  0x98   :  { %160 = vmatmul.bf16.vlgmr.msra.gmra.mxu1 %v87_v12 }
 0x115   :  { %v161_v18 = vpop.f32.mrf.mxu1 }
 0x116   :  { %v166_v20 = vmax.f32 %v161_v18, 0.0 }
 0x11d   :  { %v163_v19 = vpop.f32.mrf.mxu1 }
 0x11e   :  { %v167_v21 = vmax.f32 %v163_v19, 0.0 }
 0x120   :  { %v168_v22 = vpack.c.bf16 %v167_v21, %v166_v20 }
 0x122   :  { %176 = vmatpush.bf16.msra.mxu2 %v168_v22 }
 0x125   :  { %421 = vmatmul.msk.bf16.vlgmr.msra.gmra.mxu2 %vm69_vm0, %v650_v2 }
 0x126   :  { %344 = vmatpush.bf16.msrb.mxu2 %v512_v29 }
 0x12a   :  { %345 = vmatpush.bf16.msrb.mxu2 %v511_v30 }
 0x12e   :  { %346 = vmatpush.bf16.msrb.mxu2 %v510_v31 }
 0x132   :  { %347 = vmatpush.bf16.msrb.mxu2 %v509_v32 }
 0x136   :  { %348 = vmatpush.bf16.msrb.mxu2 %v508_v33 }
 0x13a   :  { %349 = vmatpush.bf16.msrb.mxu2 %v507_v39 }
 0x13e   :  { %350 = vmatpush.bf16.msrb.mxu2 %v506_v40 }
 0x142   :  { %351 = vmatpush.bf16.msrb.mxu2 %v505_v41 }
 0x1a8   :  { %v178_v26 = vpop.f32.mrf.mxu2 }
 0x1b0   :  { %v180_v27 = vpop.f32.mrf.mxu2 }
 0x1b1   :  { %v183_v28 = vpack.c.bf16 %v180_v27, %v178_v26 }
 0x1b3   :  { %256 = vmatmul.bf16.vlgmr.msra.gmra.mxu3 %v183_v28 }
 0x236   :  { %v257_v34 = vpop.f32.mrf.mxu3 }
 0x237   :  { %v262_v36 = vmax.f32 %v257_v34, 0.0 }
 0x23e   :  { %v259_v35 = vpop.f32.mrf.mxu3 }
 0x23f   :  { %v263_v37 = vmax.f32 %v259_v35, 0.0 }
 0x241   :  { %v264_v38 = vpack.c.bf16 %v263_v37, %v262_v36 }
 0x243   :  { %272 = vmatpush.bf16.msrb.mxu0 %v264_v38 }
 0x246   :  { %454 = vmatmul.msk.bf16.vlgmr.msrb.gmra.mxu0 %vm69_vm0, %v650_v2 }
 0x2c3   :  { %v274_v42 = vpop.f32.mrf.mxu0 }
 0x2cb   :  { %v276_v43 = vpop.f32.mrf.mxu0 }
 0x2cc   :  { %v279_v44 = vpack.c.bf16 %v276_v43, %v274_v42 }
 0x2ce   :  { %352 = vmatmul.bf16.vlgmr.msrb.gmra.mxu2 %v279_v44 }
 0x351   :  { %v353_v45 = vpop.f32.mrf.mxu2 }
 0x352   :  { %358 = vst [vmem:[#allocation7] sm:$0xff] %v353_v45 }
 0x359   :  { %v355_v46 = vpop.f32.mrf.mxu2 }
 0x35a   :  { %359 = vst [vmem:[#allocation7 + $0x8] sm:$0xff] %v355_v46 }
 0x35b   :  { %372 = dma.vmem_to_hbm [thread:$0]  %s365_s21, 256, %s367_s24, [#allocation4], %s603_s25, %s603_s25, %s604_s26  }
 0x35c   :  { %596 = dma.done.wait [#allocation4], 256  }
 0x35d   :  { %597 = vsyncadd [#allocation4], 4294967040 }
 0x35e   :  { %377 = vsyncpa [#allocation3], 1 }
 0x35f   :  { %378 = vsyncpa [#allocation6], 1 }
 0x360   :  { %379 = vsyncpa [#allocation4], 1 }

</bundles_post_ra>
